<compile_context>
chip_gen: v7x
topology: tpu7x:2x2x1
jax: 0.10.0
libtpu: 0.0.40
codegen_flags: <defaults>
</compile_context>

<pallas_src>
import functools

import jax
import jax.numpy as jnp
from jax.experimental import pallas as pl
from jax.experimental.pallas import tpu as pltpu

LN_EPS = 1e-5  # torch.nn.LayerNorm default


def _aam_kernel(r_ref, n_ref, t_ref,
                gc_ref, gp_ref, bc_ref, bp_ref,
                wc_ref, wp_ref, bias_ref,
                o_ref,
                sum_acc, cls_acc,
                *, seq_len, block_l):
    """Fused AAM head.

    Grid = (batch tiles, L tiles).  Accumulates per-modality token sums over
    the L tiles into `sum_acc` (f32), captures the cls token on the first L
    tile, and on the last L tile applies (per modality) LayerNorm over
    [cls ; patch_mean] followed by the fused block-diagonal Linear, writing
    one lane-dense (TB, 3D) output block.
    """
    dim = r_ref.shape[-1]
    l = pl.program_id(1)
    nl = pl.num_programs(1)

    # ---- init accumulators + capture cls token (global token 0 is in L-tile 0)
    @pl.when(l == 0)
    def _init():
        sum_acc[...] = jnp.zeros_like(sum_acc)
        cls_acc[:, 0 * dim:1 * dim] = r_ref[:, 0, :].astype(jnp.float32)
        cls_acc[:, 1 * dim:2 * dim] = n_ref[:, 0, :].astype(jnp.float32)
        cls_acc[:, 2 * dim:3 * dim] = t_ref[:, 0, :].astype(jnp.float32)

    # ---- accumulate token sums (f32) over this L tile; mask padded rows when
    #      block_l does not divide seq_len (padding contents are unspecified).
    needs_mask = (seq_len % block_l) != 0
    if needs_mask:
        row = jax.lax.broadcasted_iota(jnp.int32, r_ref.shape, 1)
        valid = (l * block_l + row) < seq_len

    def _accum(x_ref, m):
        x = x_ref[...].astype(jnp.float32)
        if needs_mask:
            x = jnp.where(valid, x, 0.0)
        sum_acc[:, m * dim:(m + 1) * dim] += jnp.sum(x, axis=1)

    _accum(r_ref, 0)
    _accum(n_ref, 1)
    _accum(t_ref, 2)

    # ---- finalize: LayerNorm + fused Linear + single (TB, 3D) store
    @pl.when(l == nl - 1)
    def _finalize():
        inv_lm1 = 1.0 / float(seq_len - 1)
        inv_2d = 1.0 / float(2 * dim)
        # Per-modality LayerNorm over the 2D elements [cls ; patch_mean], kept
        # as two D-wide halves (no lane-axis concatenate).  All math in f32.
        for m in range(3):
            sl = slice(m * dim, (m + 1) * dim)
            c = cls_acc[:, sl]                              # (TB, D) cls
            p = (sum_acc[:, sl] - c) * inv_lm1              # (TB, D) patch mean
            mu = (jnp.sum(c, axis=-1, keepdims=True)
                  + jnp.sum(p, axis=-1, keepdims=True)) * inv_2d
            dc = c - mu
            dp = p - mu
            var = (jnp.sum(dc * dc, axis=-1, keepdims=True)
                   + jnp.sum(dp * dp, axis=-1, keepdims=True)) * inv_2d
            rstd = jax.lax.rsqrt(var + LN_EPS)
            cls_acc[:, sl] = dc * rstd                      # reuse as normed-cls
            sum_acc[:, sl] = dp * rstd                      # reuse as normed-patch

        n_cls = cls_acc[...] * gc_ref[...] + bc_ref[...]    # (TB, 3D) f32
        n_pat = sum_acc[...] * gp_ref[...] + bp_ref[...]    # (TB, 3D) f32

        gemm_dtype = wc_ref.dtype                           # bf16 MXU path
        out = (jnp.dot(n_cls.astype(gemm_dtype), wc_ref[...],
                       preferred_element_type=jnp.float32)
               + jnp.dot(n_pat.astype(gemm_dtype), wp_ref[...],
                         preferred_element_type=jnp.float32)
               + bias_ref[...])
        o_ref[...] = out.astype(o_ref.dtype)                # one lane-dense store


def init_aam_params(key, dim):
    """Matches AAM._init_weights: Linear.weight ~ trunc_normal(std=0.02),
    Linear.bias = 0, LayerNorm.weight = 1, LayerNorm.bias = 0."""
    params = {}
    keys = jax.random.split(key, 3)
    for k, name in zip(keys, ("r", "n", "t")):
        w = 0.02 * jax.random.truncated_normal(
            k, -2.0, 2.0, (dim, 2 * dim), dtype=jnp.float32)  # torch (out, in)
        params[name] = {
            "ln_w": jnp.ones((1, 2 * dim), jnp.float32),
            "ln_b": jnp.zeros((1, 2 * dim), jnp.float32),
            "w": w.T,                                         # (2D, D) for x @ W
            "b": jnp.zeros((1, dim), jnp.float32),
        }
    return params


def _pack_params(params, dim, gemm_dtype=jnp.bfloat16):
    """Fuse the three modality heads: split LN affine / Linear weight into
    cls/patch halves and build block-diagonal (3D, 3D) GEMM weights."""
    mods = ("r", "n", "t")
    gc = jnp.concatenate([params[m]["ln_w"][:, :dim] for m in mods], axis=1)
    gp = jnp.concatenate([params[m]["ln_w"][:, dim:] for m in mods], axis=1)
    bc = jnp.concatenate([params[m]["ln_b"][:, :dim] for m in mods], axis=1)
    bp = jnp.concatenate([params[m]["ln_b"][:, dim:] for m in mods], axis=1)
    bias = jnp.concatenate([params[m]["b"] for m in mods], axis=1)

    def blkdiag(blocks):
        out = jnp.zeros((3 * dim, 3 * dim), jnp.float32)
        for i, blk in enumerate(blocks):
            out = out.at[i * dim:(i + 1) * dim, i * dim:(i + 1) * dim].set(blk)
        return out.astype(gemm_dtype)

    wc = blkdiag([params[m]["w"][:dim, :] for m in mods])   # cls halves
    wp = blkdiag([params[m]["w"][dim:, :] for m in mods])   # patch halves
    return dict(gc=gc, gp=gp, bc=bc, bp=bp, wc=wc, wp=wp, bias=bias)


def aam_forward(r, n, t, params, *, block_b=8, block_l=128,
                stream_dtype=jnp.bfloat16):
    """r, n, t: (B, L, D).  Returns (B, 3*D) float32."""
    B, L, D = r.shape
    assert n.shape == (B, L, D) and t.shape == (B, L, D)
    assert L >= 2, "need a cls token plus at least one patch token"

    packed = _pack_params(params, D)

    # L tile: full extent at small L, otherwise a multiple of 8 (sublane align).
    if L <= block_l:
        tl = L
    else:
        tl = max(8, (block_l // 8) * 8)
    nl = pl.cdiv(L, tl)

    # Batch tile: full extent at small B, otherwise a multiple of 8.
    if B <= block_b or B % 8 != 0:
        tb = B
    else:
        tb = max(8, (block_b // 8) * 8)
    nb = pl.cdiv(B, tb)

    # Stream activations as bf16 (upstream producers should emit bf16 directly).
    if r.dtype != stream_dtype:
        r = r.astype(stream_dtype)
        n = n.astype(stream_dtype)
        t = t.astype(stream_dtype)

    seq_spec = pl.BlockSpec((tb, tl, D), lambda b, l: (b, l, 0))
    vec_spec = pl.BlockSpec((1, 3 * D), lambda b, l: (0, 0))
    mat_spec = pl.BlockSpec((3 * D, 3 * D), lambda b, l: (0, 0))

    kernel = functools.partial(_aam_kernel, seq_len=L, block_l=tl)

    out = pl.pallas_call(
        kernel,
        out_shape=jax.ShapeDtypeStruct((B, 3 * D), jnp.float32),
        grid=(nb, nl),
        in_specs=[seq_spec, seq_spec, seq_spec,
                  vec_spec, vec_spec, vec_spec, vec_spec,
                  mat_spec, mat_spec, vec_spec],
        out_specs=pl.BlockSpec((tb, 3 * D), lambda b, l: (b, 0)),
        scratch_shapes=[pltpu.VMEM((tb, 3 * D), jnp.float32),   # token sums
                        pltpu.VMEM((tb, 3 * D), jnp.float32)],  # cls tokens
        compiler_params=pltpu.CompilerParams(
            dimension_semantics=("parallel", "arbitrary"),
            vmem_limit_bytes=48 * 1024 * 1024),
    )(r, n, t,
      packed["gc"], packed["gp"], packed["bc"], packed["bp"],
      packed["wc"], packed["wp"], packed["bias"])
    return out


def aam_reference(r, n, t, params):
    """Pure-JAX f32 reference for correctness check."""
    def one(x, p):
        cls_tok = x[:, 0]
        patch = jnp.mean(x[:, 1:], axis=1)
        cat = jnp.concatenate([cls_tok, patch], axis=-1)
        mu = jnp.mean(cat, axis=-1, keepdims=True)
        var = jnp.mean((cat - mu) ** 2, axis=-1, keepdims=True)
        normed = (cat - mu) / jnp.sqrt(var + LN_EPS)
        normed = normed * p["ln_w"][0] + p["ln_b"][0]
        return normed @ p["w"] + p["b"][0]
    return jnp.concatenate(
        [one(r, params["r"]), one(n, params["n"]), one(t, params["t"])], axis=-1)


if __name__ == "__main__":
    B, L, D = 2, 9, 32   # 1 cls token + 8 patch tokens, hidden dim 32
    key = jax.random.PRNGKey(0)
    k_r, k_n, k_t, k_p = jax.random.split(key, 4)

    r = jax.random.normal(k_r, (B, L, D), dtype=jnp.float32)
    n = jax.random.normal(k_n, (B, L, D), dtype=jnp.float32)
    t = jax.random.normal(k_t, (B, L, D), dtype=jnp.float32)

    params = init_aam_params(k_p, D)

    # block_l=8 forces a 2-step L reduction at L=9 so the accumulator, padding
    # mask and finalize paths are all exercised even at this small shape.
    out = aam_forward(r, n, t, params, block_l=8)
    out = jax.block_until_ready(out)
    assert out.shape == (B, 3 * D)

    # Reference consumes the same bf16-rounded inputs the kernel streams.
    rb = r.astype(jnp.bfloat16).astype(jnp.float32)
    nb16 = n.astype(jnp.bfloat16).astype(jnp.float32)
    tb16 = t.astype(jnp.bfloat16).astype(jnp.float32)
    ref = aam_reference(rb, nb16, tb16, params)

    err = float(jnp.max(jnp.abs(out - ref)))
    # bf16 activation streaming + bf16 MXU GEMM => ~1e-3 expected deviation.
    assert err < 1e-2, f"max abs err {err}"

    print("KERNEL_OK")
</pallas_src>

<mosaic_0001>
module attributes {stable_mosaic.version = 11 : i64} {
  func.func @_aam_kernel(%arg0: i32, %arg1: i32, %arg2: memref<2x8x32xbf16, #tpu.memory_space<vmem>>, %arg3: memref<2x8x32xbf16, #tpu.memory_space<vmem>>, %arg4: memref<2x8x32xbf16, #tpu.memory_space<vmem>>, %arg5: memref<1x96xf32, #tpu.memory_space<vmem>>, %arg6: memref<1x96xf32, #tpu.memory_space<vmem>>, %arg7: memref<1x96xf32, #tpu.memory_space<vmem>>, %arg8: memref<1x96xf32, #tpu.memory_space<vmem>>, %arg9: memref<96x96xbf16, #tpu.memory_space<vmem>>, %arg10: memref<96x96xbf16, #tpu.memory_space<vmem>>, %arg11: memref<1x96xf32, #tpu.memory_space<vmem>>, %arg12: memref<2x96xf32, #tpu.memory_space<vmem>>, %arg13: memref<2x96xf32, #tpu.memory_space<vmem>>, %arg14: memref<2x96xf32, #tpu.memory_space<vmem>>) attributes {dimension_semantics = [#tpu.dimension_semantics<parallel>, #tpu.dimension_semantics<arbitrary>], iteration_bounds = array<i64: 1, 2>, scalar_prefetch = 0 : i64, scratch_operands = 2 : i64, tpu.core_type = #tpu.core_type<tc>, window_params = [{transform_indices = @transform_0, window_bounds = array<i64: 2, 8, 32>}, {transform_indices = @transform_1, window_bounds = array<i64: 2, 8, 32>}, {transform_indices = @transform_2, window_bounds = array<i64: 2, 8, 32>}, {pipeline_mode = #tpu.pipeline_mode<synchronous>, transform_indices = @transform_3, window_bounds = array<i64: 1, 96>}, {pipeline_mode = #tpu.pipeline_mode<synchronous>, transform_indices = @transform_4, window_bounds = array<i64: 1, 96>}, {pipeline_mode = #tpu.pipeline_mode<synchronous>, transform_indices = @transform_5, window_bounds = array<i64: 1, 96>}, {pipeline_mode = #tpu.pipeline_mode<synchronous>, transform_indices = @transform_6, window_bounds = array<i64: 1, 96>}, {pipeline_mode = #tpu.pipeline_mode<synchronous>, transform_indices = @transform_7, window_bounds = array<i64: 96, 96>}, {pipeline_mode = #tpu.pipeline_mode<synchronous>, transform_indices = @transform_8, window_bounds = array<i64: 96, 96>}, {pipeline_mode = #tpu.pipeline_mode<synchronous>, transform_indices = @transform_9, window_bounds = array<i64: 1, 96>}, {transform_indices = @transform_10, window_bounds = array<i64: 2, 96>}]} {
    %c0_i32 = arith.constant 0 : i32
    %0 = arith.cmpi eq, %arg1, %c0_i32 : i32
    %1 = arith.extui %0 : i1 to i32
    %c0_i32_0 = arith.constant 0 : i32
    %2 = arith.cmpi ne, %1, %c0_i32_0 : i32
    scf.if %2 {
      %cst_25 = arith.constant 0.000000e+00 : f32
      %36 = vector.broadcast %cst_25 : f32 to vector<2x96xf32>
      %c0_26 = arith.constant 0 : index
      %c0_27 = arith.constant 0 : index
      %37 = vector.load %arg13[%c0_26, %c0_27] : memref<2x96xf32, #tpu.memory_space<vmem>>, vector<2x96xf32>
      tpu.vector_store %arg13[%c0_26, %c0_27], %36 {strides = array<i32>} : memref<2x96xf32, #tpu.memory_space<vmem>>, vector<2x96xf32>,
      %c0_28 = arith.constant 0 : index
      %c0_29 = arith.constant 0 : index
      %c0_30 = arith.constant 0 : index
      %38 = vector.load %arg2[%c0_28, %c0_29, %c0_30] : memref<2x8x32xbf16, #tpu.memory_space<vmem>>, vector<2x1x32xbf16>
      %39 = vector.shape_cast %38 : vector<2x1x32xbf16> to vector<2x32xbf16>
      %40 = arith.extf %39 : vector<2x32xbf16> to vector<2x32xf32>
      %c0_31 = arith.constant 0 : index
      %c0_32 = arith.constant 0 : index
      %41 = vector.load %arg14[%c0_31, %c0_32] : memref<2x96xf32, #tpu.memory_space<vmem>>, vector<2x32xf32>
      tpu.vector_store %arg14[%c0_31, %c0_32], %40 {strides = array<i32>} : memref<2x96xf32, #tpu.memory_space<vmem>>, vector<2x32xf32>,
      %c0_33 = arith.constant 0 : index
      %c0_34 = arith.constant 0 : index
      %c0_35 = arith.constant 0 : index
      %42 = vector.load %arg3[%c0_33, %c0_34, %c0_35] : memref<2x8x32xbf16, #tpu.memory_space<vmem>>, vector<2x1x32xbf16>
      %43 = vector.shape_cast %42 : vector<2x1x32xbf16> to vector<2x32xbf16>
      %44 = arith.extf %43 : vector<2x32xbf16> to vector<2x32xf32>
      %c0_36 = arith.constant 0 : index
      %c32_37 = arith.constant 32 : index
      %45 = vector.load %arg14[%c0_36, %c32_37] : memref<2x96xf32, #tpu.memory_space<vmem>>, vector<2x32xf32>
      tpu.vector_store %arg14[%c0_36, %c32_37], %44 {strides = array<i32>} : memref<2x96xf32, #tpu.memory_space<vmem>>, vector<2x32xf32>,
      %c0_38 = arith.constant 0 : index
      %c0_39 = arith.constant 0 : index
      %c0_40 = arith.constant 0 : index
      %46 = vector.load %arg4[%c0_38, %c0_39, %c0_40] : memref<2x8x32xbf16, #tpu.memory_space<vmem>>, vector<2x1x32xbf16>
      %47 = vector.shape_cast %46 : vector<2x1x32xbf16> to vector<2x32xbf16>
      %48 = arith.extf %47 : vector<2x32xbf16> to vector<2x32xf32>
      %c0_41 = arith.constant 0 : index
      %c64_42 = arith.constant 64 : index
      %49 = vector.load %arg14[%c0_41, %c64_42] : memref<2x96xf32, #tpu.memory_space<vmem>>, vector<2x32xf32>
      tpu.vector_store %arg14[%c0_41, %c64_42], %48 {strides = array<i32>} : memref<2x96xf32, #tpu.memory_space<vmem>>, vector<2x32xf32>,
    } else {
    }
    %3 = tpu.iota {dimensions = array<i32: 1>} : vector<2x8x32xi32>
    %c8_i32 = arith.constant 8 : i32
    %4 = arith.muli %arg1, %c8_i32 : i32
    %5 = vector.broadcast %4 : i32 to vector<2x8x32xi32>
    %6 = arith.addi %5, %3 : vector<2x8x32xi32>
    %c9_i32 = arith.constant 9 : i32
    %7 = vector.broadcast %c9_i32 : i32 to vector<2x8x32xi32>
    %8 = arith.cmpi slt, %6, %7 : vector<2x8x32xi32>
    %c0 = arith.constant 0 : index
    %c0_1 = arith.constant 0 : index
    %c0_2 = arith.constant 0 : index
    %9 = vector.load %arg2[%c0, %c0_1, %c0_2] : memref<2x8x32xbf16, #tpu.memory_space<vmem>>, vector<2x8x32xbf16>
    %10 = arith.extf %9 : vector<2x8x32xbf16> to vector<2x8x32xf32>
    %cst = arith.constant 0.000000e+00 : f32
    %11 = vector.broadcast %cst : f32 to vector<2x8x32xf32>
    %12 = arith.select %8, %10, %11 : vector<2x8x32xi1>, vector<2x8x32xf32>
    %c0_3 = arith.constant 0 : index
    %c0_4 = arith.constant 0 : index
    %13 = vector.load %arg13[%c0_3, %c0_4] : memref<2x96xf32, #tpu.memory_space<vmem>>, vector<2x32xf32>
    %cst_5 = arith.constant dense<0.000000e+00> : vector<2x32xf32>
    %14 = vector.multi_reduction <add>, %12, %cst_5 [1] : vector<2x8x32xf32> to vector<2x32xf32>
    %15 = arith.addf %13, %14 : vector<2x32xf32>
    %c0_6 = arith.constant 0 : index
    %c0_7 = arith.constant 0 : index
    %16 = vector.load %arg13[%c0_6, %c0_7] : memref<2x96xf32, #tpu.memory_space<vmem>>, vector<2x32xf32>
    tpu.vector_store %arg13[%c0_6, %c0_7], %15 {strides = array<i32>} : memref<2x96xf32, #tpu.memory_space<vmem>>, vector<2x32xf32>,
    %c0_8 = arith.constant 0 : index
    %c0_9 = arith.constant 0 : index
    %c0_10 = arith.constant 0 : index
    %17 = vector.load %arg3[%c0_8, %c0_9, %c0_10] : memref<2x8x32xbf16, #tpu.memory_space<vmem>>, vector<2x8x32xbf16>
    %18 = arith.extf %17 : vector<2x8x32xbf16> to vector<2x8x32xf32>
    %cst_11 = arith.constant 0.000000e+00 : f32
    %19 = vector.broadcast %cst_11 : f32 to vector<2x8x32xf32>
    %20 = arith.select %8, %18, %19 : vector<2x8x32xi1>, vector<2x8x32xf32>
    %c0_12 = arith.constant 0 : index
    %c32 = arith.constant 32 : index
    %21 = vector.load %arg13[%c0_12, %c32] : memref<2x96xf32, #tpu.memory_space<vmem>>, vector<2x32xf32>
    %cst_13 = arith.constant dense<0.000000e+00> : vector<2x32xf32>
    %22 = vector.multi_reduction <add>, %20, %cst_13 [1] : vector<2x8x32xf32> to vector<2x32xf32>
    %23 = arith.addf %21, %22 : vector<2x32xf32>
    %c0_14 = arith.constant 0 : index
    %c32_15 = arith.constant 32 : index
    %24 = vector.load %arg13[%c0_14, %c32_15] : memref<2x96xf32, #tpu.memory_space<vmem>>, vector<2x32xf32>
    tpu.vector_store %arg13[%c0_14, %c32_15], %23 {strides = array<i32>} : memref<2x96xf32, #tpu.memory_space<vmem>>, vector<2x32xf32>,
    %c0_16 = arith.constant 0 : index
    %c0_17 = arith.constant 0 : index
    %c0_18 = arith.constant 0 : index
    %25 = vector.load %arg4[%c0_16, %c0_17, %c0_18] : memref<2x8x32xbf16, #tpu.memory_space<vmem>>, vector<2x8x32xbf16>
    %26 = arith.extf %25 : vector<2x8x32xbf16> to vector<2x8x32xf32>
    %cst_19 = arith.constant 0.000000e+00 : f32
    %27 = vector.broadcast %cst_19 : f32 to vector<2x8x32xf32>
    %28 = arith.select %8, %26, %27 : vector<2x8x32xi1>, vector<2x8x32xf32>
    %c0_20 = arith.constant 0 : index
    %c64 = arith.constant 64 : index
    %29 = vector.load %arg13[%c0_20, %c64] : memref<2x96xf32, #tpu.memory_space<vmem>>, vector<2x32xf32>
    %cst_21 = arith.constant dense<0.000000e+00> : vector<2x32xf32>
    %30 = vector.multi_reduction <add>, %28, %cst_21 [1] : vector<2x8x32xf32> to vector<2x32xf32>
    %31 = arith.addf %29, %30 : vector<2x32xf32>
    %c0_22 = arith.constant 0 : index
    %c64_23 = arith.constant 64 : index
    %32 = vector.load %arg13[%c0_22, %c64_23] : memref<2x96xf32, #tpu.memory_space<vmem>>, vector<2x32xf32>
    tpu.vector_store %arg13[%c0_22, %c64_23], %31 {strides = array<i32>} : memref<2x96xf32, #tpu.memory_space<vmem>>, vector<2x32xf32>,
    %c1_i32 = arith.constant 1 : i32
    %33 = arith.cmpi eq, %arg1, %c1_i32 : i32
    %34 = arith.extui %33 : i1 to i32
    %c0_i32_24 = arith.constant 0 : i32
    %35 = arith.cmpi ne, %34, %c0_i32_24 : i32
    scf.if %35 {
      %c0_25 = arith.constant 0 : index
      %c0_26 = arith.constant 0 : index
      %36 = vector.load %arg14[%c0_25, %c0_26] : memref<2x96xf32, #tpu.memory_space<vmem>>, vector<2x32xf32>
      %c0_27 = arith.constant 0 : index
      %c0_28 = arith.constant 0 : index
      %37 = vector.load %arg13[%c0_27, %c0_28] : memref<2x96xf32, #tpu.memory_space<vmem>>, vector<2x32xf32>
      %38 = arith.subf %37, %36 : vector<2x32xf32>
      %cst_29 = arith.constant 1.250000e-01 : f32
      %39 = vector.broadcast %cst_29 : f32 to vector<2x32xf32>
      %40 = arith.mulf %38, %39 : vector<2x32xf32>
      %cst_30 = arith.constant dense<0.000000e+00> : vector<2xf32>
      %41 = vector.multi_reduction <add>, %36, %cst_30 [1] : vector<2x32xf32> to vector<2xf32>
      %42 = vector.shape_cast %41 : vector<2xf32> to vector<2x1xf32>
      %cst_31 = arith.constant dense<0.000000e+00> : vector<2xf32>
      %43 = vector.multi_reduction <add>, %40, %cst_31 [1] : vector<2x32xf32> to vector<2xf32>
      %44 = vector.shape_cast %43 : vector<2xf32> to vector<2x1xf32>
      %45 = arith.addf %42, %44 : vector<2x1xf32>
      %cst_32 = arith.constant 1.562500e-02 : f32
      %46 = vector.broadcast %cst_32 : f32 to vector<2x1xf32>
      %47 = arith.mulf %45, %46 : vector<2x1xf32>
      %48 = vector.broadcast %47 : vector<2x1xf32> to vector<2x32xf32>
      %49 = arith.subf %36, %48 : vector<2x32xf32>
      %50 = vector.broadcast %47 : vector<2x1xf32> to vector<2x32xf32>
      %51 = arith.subf %40, %50 : vector<2x32xf32>
      %52 = arith.mulf %49, %49 : vector<2x32xf32>
      %cst_33 = arith.constant dense<0.000000e+00> : vector<2xf32>
      %53 = vector.multi_reduction <add>, %52, %cst_33 [1] : vector<2x32xf32> to vector<2xf32>
      %54 = vector.shape_cast %53 : vector<2xf32> to vector<2x1xf32>
      %55 = arith.mulf %51, %51 : vector<2x32xf32>
      %cst_34 = arith.constant dense<0.000000e+00> : vector<2xf32>
      %56 = vector.multi_reduction <add>, %55, %cst_34 [1] : vector<2x32xf32> to vector<2xf32>
      %57 = vector.shape_cast %56 : vector<2xf32> to vector<2x1xf32>
      %58 = arith.addf %54, %57 : vector<2x1xf32>
      %cst_35 = arith.constant 1.562500e-02 : f32
      %59 = vector.broadcast %cst_35 : f32 to vector<2x1xf32>
      %60 = arith.mulf %58, %59 : vector<2x1xf32>
      %cst_36 = arith.constant 9.99999974E-6 : f32
      %61 = vector.broadcast %cst_36 : f32 to vector<2x1xf32>
      %62 = arith.addf %60, %61 : vector<2x1xf32>
      %63 = math.rsqrt %62 : vector<2x1xf32>
      %64 = vector.broadcast %63 : vector<2x1xf32> to vector<2x32xf32>
      %65 = arith.mulf %49, %64 : vector<2x32xf32>
      %c0_37 = arith.constant 0 : index
      %c0_38 = arith.constant 0 : index
      %66 = vector.load %arg14[%c0_37, %c0_38] : memref<2x96xf32, #tpu.memory_space<vmem>>, vector<2x32xf32>
      tpu.vector_store %arg14[%c0_37, %c0_38], %65 {strides = array<i32>} : memref<2x96xf32, #tpu.memory_space<vmem>>, vector<2x32xf32>,
      %67 = vector.broadcast %63 : vector<2x1xf32> to vector<2x32xf32>
      %68 = arith.mulf %51, %67 : vector<2x32xf32>
      %c0_39 = arith.constant 0 : index
      %c0_40 = arith.constant 0 : index
      %69 = vector.load %arg13[%c0_39, %c0_40] : memref<2x96xf32, #tpu.memory_space<vmem>>, vector<2x32xf32>
      tpu.vector_store %arg13[%c0_39, %c0_40], %68 {strides = array<i32>} : memref<2x96xf32, #tpu.memory_space<vmem>>, vector<2x32xf32>,
      %c0_41 = arith.constant 0 : index
      %c32_42 = arith.constant 32 : index
      %70 = vector.load %arg14[%c0_41, %c32_42] : memref<2x96xf32, #tpu.memory_space<vmem>>, vector<2x32xf32>
      %c0_43 = arith.constant 0 : index
      %c32_44 = arith.constant 32 : index
      %71 = vector.load %arg13[%c0_43, %c32_44] : memref<2x96xf32, #tpu.memory_space<vmem>>, vector<2x32xf32>
      %72 = arith.subf %71, %70 : vector<2x32xf32>
      %cst_45 = arith.constant 1.250000e-01 : f32
      %73 = vector.broadcast %cst_45 : f32 to vector<2x32xf32>
      %74 = arith.mulf %72, %73 : vector<2x32xf32>
      %cst_46 = arith.constant dense<0.000000e+00> : vector<2xf32>
      %75 = vector.multi_reduction <add>, %70, %cst_46 [1] : vector<2x32xf32> to vector<2xf32>
      %76 = vector.shape_cast %75 : vector<2xf32> to vector<2x1xf32>
      %cst_47 = arith.constant dense<0.000000e+00> : vector<2xf32>
      %77 = vector.multi_reduction <add>, %74, %cst_47 [1] : vector<2x32xf32> to vector<2xf32>
      %78 = vector.shape_cast %77 : vector<2xf32> to vector<2x1xf32>
      %79 = arith.addf %76, %78 : vector<2x1xf32>
      %cst_48 = arith.constant 1.562500e-02 : f32
      %80 = vector.broadcast %cst_48 : f32 to vector<2x1xf32>
      %81 = arith.mulf %79, %80 : vector<2x1xf32>
      %82 = vector.broadcast %81 : vector<2x1xf32> to vector<2x32xf32>
      %83 = arith.subf %70, %82 : vector<2x32xf32>
      %84 = vector.broadcast %81 : vector<2x1xf32> to vector<2x32xf32>
      %85 = arith.subf %74, %84 : vector<2x32xf32>
      %86 = arith.mulf %83, %83 : vector<2x32xf32>
      %cst_49 = arith.constant dense<0.000000e+00> : vector<2xf32>
      %87 = vector.multi_reduction <add>, %86, %cst_49 [1] : vector<2x32xf32> to vector<2xf32>
      %88 = vector.shape_cast %87 : vector<2xf32> to vector<2x1xf32>
      %89 = arith.mulf %85, %85 : vector<2x32xf32>
      %cst_50 = arith.constant dense<0.000000e+00> : vector<2xf32>
      %90 = vector.multi_reduction <add>, %89, %cst_50 [1] : vector<2x32xf32> to vector<2xf32>
      %91 = vector.shape_cast %90 : vector<2xf32> to vector<2x1xf32>
      %92 = arith.addf %88, %91 : vector<2x1xf32>
      %cst_51 = arith.constant 1.562500e-02 : f32
      %93 = vector.broadcast %cst_51 : f32 to vector<2x1xf32>
      %94 = arith.mulf %92, %93 : vector<2x1xf32>
      %cst_52 = arith.constant 9.99999974E-6 : f32
      %95 = vector.broadcast %cst_52 : f32 to vector<2x1xf32>
      %96 = arith.addf %94, %95 : vector<2x1xf32>
      %97 = math.rsqrt %96 : vector<2x1xf32>
      %98 = vector.broadcast %97 : vector<2x1xf32> to vector<2x32xf32>
      %99 = arith.mulf %83, %98 : vector<2x32xf32>
      %c0_53 = arith.constant 0 : index
      %c32_54 = arith.constant 32 : index
      %100 = vector.load %arg14[%c0_53, %c32_54] : memref<2x96xf32, #tpu.memory_space<vmem>>, vector<2x32xf32>
      tpu.vector_store %arg14[%c0_53, %c32_54], %99 {strides = array<i32>} : memref<2x96xf32, #tpu.memory_space<vmem>>, vector<2x32xf32>,
      %101 = vector.broadcast %97 : vector<2x1xf32> to vector<2x32xf32>
      %102 = arith.mulf %85, %101 : vector<2x32xf32>
      %c0_55 = arith.constant 0 : index
      %c32_56 = arith.constant 32 : index
      %103 = vector.load %arg13[%c0_55, %c32_56] : memref<2x96xf32, #tpu.memory_space<vmem>>, vector<2x32xf32>
      tpu.vector_store %arg13[%c0_55, %c32_56], %102 {strides = array<i32>} : memref<2x96xf32, #tpu.memory_space<vmem>>, vector<2x32xf32>,
      %c0_57 = arith.constant 0 : index
      %c64_58 = arith.constant 64 : index
      %104 = vector.load %arg14[%c0_57, %c64_58] : memref<2x96xf32, #tpu.memory_space<vmem>>, vector<2x32xf32>
      %c0_59 = arith.constant 0 : index
      %c64_60 = arith.constant 64 : index
      %105 = vector.load %arg13[%c0_59, %c64_60] : memref<2x96xf32, #tpu.memory_space<vmem>>, vector<2x32xf32>
      %106 = arith.subf %105, %104 : vector<2x32xf32>
      %cst_61 = arith.constant 1.250000e-01 : f32
      %107 = vector.broadcast %cst_61 : f32 to vector<2x32xf32>
      %108 = arith.mulf %106, %107 : vector<2x32xf32>
      %cst_62 = arith.constant dense<0.000000e+00> : vector<2xf32>
      %109 = vector.multi_reduction <add>, %104, %cst_62 [1] : vector<2x32xf32> to vector<2xf32>
      %110 = vector.shape_cast %109 : vector<2xf32> to vector<2x1xf32>
      %cst_63 = arith.constant dense<0.000000e+00> : vector<2xf32>
      %111 = vector.multi_reduction <add>, %108, %cst_63 [1] : vector<2x32xf32> to vector<2xf32>
      %112 = vector.shape_cast %111 : vector<2xf32> to vector<2x1xf32>
      %113 = arith.addf %110, %112 : vector<2x1xf32>
      %cst_64 = arith.constant 1.562500e-02 : f32
      %114 = vector.broadcast %cst_64 : f32 to vector<2x1xf32>
      %115 = arith.mulf %113, %114 : vector<2x1xf32>
      %116 = vector.broadcast %115 : vector<2x1xf32> to vector<2x32xf32>
      %117 = arith.subf %104, %116 : vector<2x32xf32>
      %118 = vector.broadcast %115 : vector<2x1xf32> to vector<2x32xf32>
      %119 = arith.subf %108, %118 : vector<2x32xf32>
      %120 = arith.mulf %117, %117 : vector<2x32xf32>
      %cst_65 = arith.constant dense<0.000000e+00> : vector<2xf32>
      %121 = vector.multi_reduction <add>, %120, %cst_65 [1] : vector<2x32xf32> to vector<2xf32>
      %122 = vector.shape_cast %121 : vector<2xf32> to vector<2x1xf32>
      %123 = arith.mulf %119, %119 : vector<2x32xf32>
      %cst_66 = arith.constant dense<0.000000e+00> : vector<2xf32>
      %124 = vector.multi_reduction <add>, %123, %cst_66 [1] : vector<2x32xf32> to vector<2xf32>
      %125 = vector.shape_cast %124 : vector<2xf32> to vector<2x1xf32>
      %126 = arith.addf %122, %125 : vector<2x1xf32>
      %cst_67 = arith.constant 1.562500e-02 : f32
      %127 = vector.broadcast %cst_67 : f32 to vector<2x1xf32>
      %128 = arith.mulf %126, %127 : vector<2x1xf32>
      %cst_68 = arith.constant 9.99999974E-6 : f32
      %129 = vector.broadcast %cst_68 : f32 to vector<2x1xf32>
      %130 = arith.addf %128, %129 : vector<2x1xf32>
      %131 = math.rsqrt %130 : vector<2x1xf32>
      %132 = vector.broadcast %131 : vector<2x1xf32> to vector<2x32xf32>
      %133 = arith.mulf %117, %132 : vector<2x32xf32>
      %c0_69 = arith.constant 0 : index
      %c64_70 = arith.constant 64 : index
      %134 = vector.load %arg14[%c0_69, %c64_70] : memref<2x96xf32, #tpu.memory_space<vmem>>, vector<2x32xf32>
      tpu.vector_store %arg14[%c0_69, %c64_70], %133 {strides = array<i32>} : memref<2x96xf32, #tpu.memory_space<vmem>>, vector<2x32xf32>,
      %135 = vector.broadcast %131 : vector<2x1xf32> to vector<2x32xf32>
      %136 = arith.mulf %119, %135 : vector<2x32xf32>
      %c0_71 = arith.constant 0 : index
      %c64_72 = arith.constant 64 : index
      %137 = vector.load %arg13[%c0_71, %c64_72] : memref<2x96xf32, #tpu.memory_space<vmem>>, vector<2x32xf32>
      tpu.vector_store %arg13[%c0_71, %c64_72], %136 {strides = array<i32>} : memref<2x96xf32, #tpu.memory_space<vmem>>, vector<2x32xf32>,
      %c0_73 = arith.constant 0 : index
      %c0_74 = arith.constant 0 : index
      %138 = vector.load %arg14[%c0_73, %c0_74] : memref<2x96xf32, #tpu.memory_space<vmem>>, vector<2x96xf32>
      %c0_75 = arith.constant 0 : index
      %c0_76 = arith.constant 0 : index
      %139 = vector.load %arg5[%c0_75, %c0_76] : memref<1x96xf32, #tpu.memory_space<vmem>>, vector<1x96xf32>
      %140 = vector.broadcast %139 : vector<1x96xf32> to vector<2x96xf32>
      %141 = arith.mulf %138, %140 : vector<2x96xf32>
      %c0_77 = arith.constant 0 : index
      %c0_78 = arith.constant 0 : index
      %142 = vector.load %arg7[%c0_77, %c0_78] : memref<1x96xf32, #tpu.memory_space<vmem>>, vector<1x96xf32>
      %143 = vector.broadcast %142 : vector<1x96xf32> to vector<2x96xf32>
      %144 = arith.addf %141, %143 : vector<2x96xf32>
      %c0_79 = arith.constant 0 : index
      %c0_80 = arith.constant 0 : index
      %145 = vector.load %arg13[%c0_79, %c0_80] : memref<2x96xf32, #tpu.memory_space<vmem>>, vector<2x96xf32>
      %c0_81 = arith.constant 0 : index
      %c0_82 = arith.constant 0 : index
      %146 = vector.load %arg6[%c0_81, %c0_82] : memref<1x96xf32, #tpu.memory_space<vmem>>, vector<1x96xf32>
      %147 = vector.broadcast %146 : vector<1x96xf32> to vector<2x96xf32>
      %148 = arith.mulf %145, %147 : vector<2x96xf32>
      %c0_83 = arith.constant 0 : index
      %c0_84 = arith.constant 0 : index
      %149 = vector.load %arg8[%c0_83, %c0_84] : memref<1x96xf32, #tpu.memory_space<vmem>>, vector<1x96xf32>
      %150 = vector.broadcast %149 : vector<1x96xf32> to vector<2x96xf32>
      %151 = arith.addf %148, %150 : vector<2x96xf32>
      %152 = arith.truncf %144 : vector<2x96xf32> to vector<2x96xbf16>
      %c0_85 = arith.constant 0 : index
      %c0_86 = arith.constant 0 : index
      %153 = vector.load %arg9[%c0_85, %c0_86] : memref<96x96xbf16, #tpu.memory_space<vmem>>, vector<96x96xbf16>
      %cst_87 = arith.constant dense<0.000000e+00> : vector<2x96xf32>
      %154 = tpu.matmul %152, %153, %cst_87 {dimension_numbers = #tpu.dot_dimension_numbers<[1], [0], [0], [1], [0, 0, 1, 1], [], []>} : vector<2x96xbf16>, vector<96x96xbf16>, vector<2x96xf32> -> vector<2x96xf32>
      %155 = arith.truncf %151 : vector<2x96xf32> to vector<2x96xbf16>
      %c0_88 = arith.constant 0 : index
      %c0_89 = arith.constant 0 : index
      %156 = vector.load %arg10[%c0_88, %c0_89] : memref<96x96xbf16, #tpu.memory_space<vmem>>, vector<96x96xbf16>
      %cst_90 = arith.constant dense<0.000000e+00> : vector<2x96xf32>
      %157 = tpu.matmul %155, %156, %cst_90 {dimension_numbers = #tpu.dot_dimension_numbers<[1], [0], [0], [1], [0, 0, 1, 1], [], []>} : vector<2x96xbf16>, vector<96x96xbf16>, vector<2x96xf32> -> vector<2x96xf32>
      %158 = arith.addf %154, %157 : vector<2x96xf32>
      %c0_91 = arith.constant 0 : index
      %c0_92 = arith.constant 0 : index
      %159 = vector.load %arg11[%c0_91, %c0_92] : memref<1x96xf32, #tpu.memory_space<vmem>>, vector<1x96xf32>
      %160 = vector.broadcast %159 : vector<1x96xf32> to vector<2x96xf32>
      %161 = arith.addf %158, %160 : vector<2x96xf32>
      %c0_93 = arith.constant 0 : index
      %c0_94 = arith.constant 0 : index
      %162 = vector.load %arg12[%c0_93, %c0_94] : memref<2x96xf32, #tpu.memory_space<vmem>>, vector<2x96xf32>
      tpu.vector_store %arg12[%c0_93, %c0_94], %161 {strides = array<i32>} : memref<2x96xf32, #tpu.memory_space<vmem>>, vector<2x96xf32>,
    } else {
    }
    return
  }
  func.func @transform_0(%arg0: i32, %arg1: i32) -> (i32, i32, i32) {
    %c0_i32 = arith.constant 0 : i32
    %c0_i32_0 = arith.constant 0 : i32
    return %arg0, %arg1, %c0_i32 : i32, i32, i32
  }
  func.func @transform_1(%arg0: i32, %arg1: i32) -> (i32, i32, i32) {
    %c0_i32 = arith.constant 0 : i32
    %c0_i32_0 = arith.constant 0 : i32
    return %arg0, %arg1, %c0_i32 : i32, i32, i32
  }
  func.func @transform_2(%arg0: i32, %arg1: i32) -> (i32, i32, i32) {
    %c0_i32 = arith.constant 0 : i32
    %c0_i32_0 = arith.constant 0 : i32
    return %arg0, %arg1, %c0_i32 : i32, i32, i32
  }
  func.func @transform_3(%arg0: i32, %arg1: i32) -> (i32, i32) {
    %c0_i32 = arith.constant 0 : i32
    %c0_i32_0 = arith.constant 0 : i32
    %c0_i32_1 = arith.constant 0 : i32
    return %c0_i32, %c0_i32_0 : i32, i32
  }
  func.func @transform_4(%arg0: i32, %arg1: i32) -> (i32, i32) {
    %c0_i32 = arith.constant 0 : i32
    %c0_i32_0 = arith.constant 0 : i32
    %c0_i32_1 = arith.constant 0 : i32
    return %c0_i32, %c0_i32_0 : i32, i32
  }
  func.func @transform_5(%arg0: i32, %arg1: i32) -> (i32, i32) {
    %c0_i32 = arith.constant 0 : i32
    %c0_i32_0 = arith.constant 0 : i32
    %c0_i32_1 = arith.constant 0 : i32
    return %c0_i32, %c0_i32_0 : i32, i32
  }
  func.func @transform_6(%arg0: i32, %arg1: i32) -> (i32, i32) {
    %c0_i32 = arith.constant 0 : i32
    %c0_i32_0 = arith.constant 0 : i32
    %c0_i32_1 = arith.constant 0 : i32
    return %c0_i32, %c0_i32_0 : i32, i32
  }
  func.func @transform_7(%arg0: i32, %arg1: i32) -> (i32, i32) {
    %c0_i32 = arith.constant 0 : i32
    %c0_i32_0 = arith.constant 0 : i32
    %c0_i32_1 = arith.constant 0 : i32
    return %c0_i32, %c0_i32_0 : i32, i32
  }
  func.func @transform_8(%arg0: i32, %arg1: i32) -> (i32, i32) {
    %c0_i32 = arith.constant 0 : i32
    %c0_i32_0 = arith.constant 0 : i32
    %c0_i32_1 = arith.constant 0 : i32
    return %c0_i32, %c0_i32_0 : i32, i32
  }
  func.func @transform_9(%arg0: i32, %arg1: i32) -> (i32, i32) {
    %c0_i32 = arith.constant 0 : i32
    %c0_i32_0 = arith.constant 0 : i32
    %c0_i32_1 = arith.constant 0 : i32
    return %c0_i32, %c0_i32_0 : i32, i32
  }
  func.func @transform_10(%arg0: i32, %arg1: i32) -> (i32, i32) {
    %c0_i32 = arith.constant 0 : i32
    %c0_i32_0 = arith.constant 0 : i32
    return %arg0, %c0_i32 : i32, i32
  }
}

</mosaic_0001>

<bundles_post_ra>
// kernel: tpu_custom_call.1
= control target key start
LH: loop header
LB: loop body
LE: loop exit
PB: predicated region body
PF: predicated region fallthrough
CT: control target
= control target key end

     0   :  { %s1963_s0 = inlined_call_operand.vmem [shape: bf16[2,9,32], index: 0, kind: input, shape index: {}]   ;;  %s1964_s1 = inlined_call_operand.vmem [shape: bf16[2,9,32], index: 1, kind: input, shape index: {}]   ;;  %s1965_s2 = inlined_call_operand.vmem [shape: bf16[2,9,32], index: 2, kind: input, shape index: {}]   ;;  %s1966_s3 = inlined_call_operand.vmem [shape: f32[1,96], index: 3, kind: input, shape index: {}]   ;;  %s1967_s4 = inlined_call_operand.hbm [shape: f32[1,96], index: 4, kind: input, shape index: {}]   ;;  %s1968_s5 = inlined_call_operand.hbm [shape: f32[1,96], index: 5, kind: input, shape index: {}]   ;;  %s1969_s6 = inlined_call_operand.hbm [shape: f32[1,96], index: 6, kind: input, shape index: {}]   ;;  %s1970_s7 = inlined_call_operand.vmem [shape: bf16[96,96], index: 7, kind: input, shape index: {}]   ;;  %s1971_s8 = inlined_call_operand.vmem [shape: bf16[96,96], index: 8, kind: input, shape index: {}]   ;;  %s1972_s9 = inlined_call_operand.vmem [shape: f32[1,96], index: 9, kind: input, shape index: {}]   ;;  %s1973_s10 = inlined_call_operand.hbm [shape: f32[2,96], index: 10, kind: output, shape index: {}]  }
   0x1   :  { %1980 = sst [smem:[#allocation19_spill]] %s1968_s5 }
   0x2   :  { %1981 = sst [smem:[#allocation20_spill]] %s1973_s10 }
   0x3   :  { %15 = vsyncpa [#allocation8], 0 }
   0x4   :  { %16 = vsyncpa [#allocation11], 0 }
   0x5   :  { %17 = vsyncpa [#allocation9], 0  ;;  %s1666_s13 = smov 0   ;;  %s1668_s14 = smov 0  }
   0x6   :  { %s1670_s15 = smov 0   ;;  %s1672_s16 = smov 0  }
   0x7   :  { %s1674_s17 = smov 0  }
   0x8 LB: > { %s1974_s18 = sadd.s32 4294967295, %s1596_s17   ;;  %s32_s19 = sadd.s32 1, %s1592_s16  ;;  %s1596_s17 = sphi %s1674_s17, %s23_s17   ;;  %s1592_s16 = sphi %s1672_s16, %s2003_s16   ;;  %s1588_s15 = sphi %s1670_s15, %s2002_s15   ;;  %s1584_s14 = sphi %s1668_s14, %s2001_s14   ;;  %s1580_s13 = sphi %s1666_s13, %s2000_s13  }
   0x9   : > { %p33_p0 = scmp.ge.s32.totalorder %s32_s19, 2  ;;  %s44_s20 = sadd.s32 1, %s1584_s14 }
   0xa   : > { %p51_p1 = scmp.ne.s32.totalorder %s1584_s14, %s1580_s13  ;;  %p52_p2 = scmp.eq.s32.totalorder %s1596_s17, 0 }
   0xb   : > { %s2005_s19 = smov (%p33_p0, %s32_s19), 0  ;;  %p1229_p4 = scmp.ge.s32.totalorder %s1596_s17, 1 }
   0xc   : > { %1982 = sst [smem:[#allocation17_spill]] %s2005_s19  ;;  %p1699_p3 = por %p52_p2, %p51_p1 }
   0xd   : > { %s40_s22 = ssub.s32 %s1592_s16, %s2005_s19  ;;  %p297_p5 = scmp.lt.s32.totalorder %s1596_s17, 3 }
   0xe   : > { %s1983_s21 = scalar_select %p1699_p3, 1, 0 }
   0xf   : > { %p42_p6 = scmp.eq.s32.totalorder %s40_s22, 0  ;;  %p1707_p7 = pnand %p1229_p4, %p297_p5 }
  0x10   : > { %p1713_p8 = scmp.eq.s32.totalorder %s1974_s18, 0  ;;  %s1598_s26 = smov [#allocation10]  }
  0x11   : > { %s1984_s23 = scalar_select %p1707_p7, 1, 0 }
  0x12   : > { %s1985_s24 = scalar_select %p1713_p8, 1, 0 }
  0x13   : > { %s1718_s25 = scalar_select %p42_p6, %s1584_s14, %s44_s20  }
  0x14   : > { %p1347_p9 = pneg %p1707_p7  ;;  %s324_s27 = sshll.u32 %s1598_s26, 4  ;;  %s325_s27 = int_to_ptr.vmem [resolvable:$true] %s324_s27 }
  0x15   : > { %1986 = sst [smem:[#allocation18_spill]] %s1718_s25  ;;  %s1599_s29 = smov [#allocation7]  }
  0x16   : > { %p1724_p10 = pnand %p1713_p8, %p1347_p9  ;;  %s313_s30 = sshll.u32 %s1599_s29, 4  ;;  %s314_s30 = int_to_ptr.vmem [resolvable:$true] %s313_s30 }
  0x17   : > { %s1988_s5 = sld [smem:[#allocation19_spill]] }
  0x18   : > { %p1736_p12 = pneg %p1724_p10 }
  0x1d   : > { %s1436_s22 = scalar_lea.hbm %s1988_s5, 16 }
  0x1e   : > { %p1437_p11 = scmp.ne.s32.totalorder %s1988_s5, %s1436_s22  ;;  %p1443_p1 = scmp.lt.u32.totalorder %s1436_s22, %s1988_s5 }
  0x20   : > { %p1439_p13 = pnand %p1736_p12, %p1437_p11 }
  0x22   : > { %p1440_p0 = pneg %p1439_p13 }
  0x24   : > { %p1445_p2 = pnand %p1443_p1, %p1440_p0 }
  0x26   : > { %1448 = shalt.err (!%p1445_p2)
}
  0x27   : > { %s1449_s29 = scalar_lea.vmem %s325_s27, 16  ;;  %s1456_s18 = scalar_lea.vmem %s325_s27, 32 }
  0x28   : > { %p1450_p4 = scmp.ne.s32.totalorder %s325_s27, %s1449_s29  ;;  %p1457_p9 = scmp.lt.s32.totalorder %s325_s27, %s325_s27 }
  0x29   : > { %p1458_p8 = scmp.lt.s32.totalorder %s1456_s18, %s1449_s29 }
  0x2a   : > { %p1452_p5 = pnand %p1450_p4, %p1736_p12 }
  0x2b   : > { %p1459_p7 = por %p1458_p8, %p1457_p9 }
  0x2c   : > { %p1453_p6 = pneg %p1452_p5 }
  0x2e   : > { %p1460_p3 = pnand %p1459_p7, %p1453_p6 }
  0x30   : > { %1463 = shalt.err (!%p1460_p3)
}
  0x31   : > { %1353 = dma.hbm_to_vmem [thread:$0]  (!%p1724_p10), %s1988_s5, 16, %s325_s27, [#allocation11]  }
  0x32   : > { %s1464_s22 = scalar_lea.hbm %s1967_s4, 16 }
  0x33   : > { %p1465_p11 = scmp.ne.s32.totalorder %s1967_s4, %s1464_s22  ;;  %p1471_p3 = scmp.lt.u32.totalorder %s1464_s22, %s1967_s4 }
  0x35   : > { %p1467_p8 = pnand %p1465_p11, %p1736_p12 }
  0x37   : > { %p1468_p7 = pneg %p1467_p8 }
  0x39   : > { %p1473_p13 = pnand %p1471_p3, %p1468_p7 }
  0x3b   : > { %1476 = shalt.err (!%p1473_p13)
}
  0x3c   : > { %s1477_s11 = scalar_lea.vmem %s314_s30, 16  ;;  %s1484_s27 = scalar_lea.vmem %s314_s30, 32 }
  0x3d   : > { %p1478_p0 = scmp.ne.s32.totalorder %s314_s30, %s1477_s11  ;;  %p1485_p4 = scmp.lt.s32.totalorder %s314_s30, %s314_s30 }
  0x3e   : > { %p1486_p5 = scmp.lt.s32.totalorder %s1484_s27, %s1477_s11 }
  0x3f   : > { %p1480_p1 = pnand %p1478_p0, %p1736_p12 }
  0x40   : > { %p1487_p6 = por %p1486_p5, %p1485_p4 }
  0x41   : > { %p1481_p2 = pneg %p1480_p1 }
  0x43   : > { %p1488_p9 = pnand %p1487_p6, %p1481_p2 }
  0x45   : > { %1491 = shalt.err (!%p1488_p9)
}
  0x46   : > { %1350 = dma.hbm_to_vmem [thread:$0]  (!%p1724_p10), %s1967_s4, 16, %s314_s30, [#allocation8]  }
  0x47   : > { %s1600_s19 = smov [#allocation12]   ;;  %s1492_s29 = scalar_lea.hbm %s1969_s6, 16 }
  0x48   : > { %s335_s25 = sshll.u32 %s1600_s19, 4  ;;  %p1493_p11 = scmp.ne.s32.totalorder %s1969_s6, %s1492_s29  ;;  %s336_s25 = int_to_ptr.vmem [resolvable:$true] %s335_s25 }
  0x49   : > { %p1499_p3 = scmp.lt.u32.totalorder %s1492_s29, %s1969_s6 }
  0x4a   : > { %p1495_p8 = pnand %p1493_p11, %p1736_p12 }
  0x4c   : > { %p1496_p7 = pneg %p1495_p8 }
  0x4e   : > { %p1501_p13 = pnand %p1499_p3, %p1496_p7 }
  0x50   : > { %1504 = shalt.err (!%p1501_p13)
}
  0x51   : > { %s1505_s30 = scalar_lea.vmem %s336_s25, 16  ;;  %s1512_s10 = scalar_lea.vmem %s336_s25, 32 }
  0x52   : > { %p1506_p0 = scmp.ne.s32.totalorder %s336_s25, %s1505_s30  ;;  %p1513_p4 = scmp.lt.s32.totalorder %s336_s25, %s336_s25 }
  0x53   : > { %p1514_p5 = scmp.lt.s32.totalorder %s1512_s10, %s1505_s30 }
  0x54   : > { %p1508_p1 = pnand %p1506_p0, %p1736_p12 }
  0x55   : > { %p1515_p6 = por %p1514_p5, %p1513_p4 }
  0x56   : > { %p1509_p2 = pneg %p1508_p1 }
  0x58   : > { %p1516_p9 = pnand %p1515_p6, %p1509_p2 }
  0x5a   : > { %1519 = shalt.err (!%p1516_p9)
}
  0x5b   : > { %1356 = dma.hbm_to_vmem [thread:$0]  (!%p1724_p10), %s1969_s6, 16, %s336_s25, [#allocation11]  }
  0x5c   : > { %p1233_p11 = scmp.ge.s32.totalorder %s1596_s17, 2 }
  0x5d   : > { %p1990_p8 = scmp.ne.s32.totalorder (!%p1233_p11), %s1983_s21, 0 }
  0x5e   : > { %351 = sbr.rel (%p1233_p11) target bundleno = 126 (0x7e), region = 44 }
  0x65   : > { %354 = sbr.rel (!%p1990_p8) target bundleno = 108 (0x6c), region = 48  ;;  %s356_s26 = sand.u32 (%p1990_p8), 1, %s1584_s14  }
  0x66   : > { %s1235_s19 = sshll.u32 (%p1990_p8), %s1592_s16, 2  ;;  %s1234_s22 = sshll.u32 (%p1990_p8), %s356_s26, 3 }
  0x67   : > { %s363_s18 = scalar_lea.vmem (%p1990_p8), %s1963_s0, %s1235_s19  ;;  %s358_s28 = scalar_lea.vmem (%p1990_p8), [#allocation4], %s1234_s22 }
  0x68   : > { %v379_v0 = vld [vmem:[%s363_s18] sm:$0xf] (%p1990_p8)  ;;  %v381_v1 = vld [vmem:[%s363_s18 + $0x8] sm:$0xf] (%p1990_p8) }
  0x69   : > { %380 = vst [vmem:[%s358_s28] sm:$0xf] (%p1990_p8), %v379_v0  ;;  %382 = vst [vmem:[%s358_s28 + $0x4] sm:$0xf] (%p1990_p8), %v381_v1 }
  0x6c PF: > { %p1991_p10 = scmp.ne.s32.totalorder %s1983_s21, 0 }
  0x6d   : > { %s411_s25 = sand.u32 (%p1991_p10), 1, %s1584_s14   ;;  %s1237_s11 = sshll.u32 (%p1991_p10), %s1592_s16, 2 }
  0x6e   : > { %409 = sbr.rel (!%p1991_p10) target bundleno = 117 (0x75), region = 89  ;;  %s1236_s27 = sshll.u32 (%p1991_p10), %s411_s25, 3 }
  0x6f   : > { %s418_s5 = scalar_lea.vmem (%p1991_p10), %s1964_s1, %s1237_s11  ;;  %s413_s12 = scalar_lea.vmem (%p1991_p10), [#allocation5], %s1236_s27 }
  0x70   : > { %v434_v2 = vld [vmem:[%s418_s5] sm:$0xf] (%p1991_p10)  ;;  %v436_v3 = vld [vmem:[%s418_s5 + $0x8] sm:$0xf] (%p1991_p10) }
  0x71   : > { %435 = vst [vmem:[%s413_s12] sm:$0xf] (%p1991_p10), %v434_v2  ;;  %437 = vst [vmem:[%s413_s12 + $0x4] sm:$0xf] (%p1991_p10), %v436_v3 }
  0x75 PF: > { %p1992_p12 = scmp.ne.s32.totalorder %s1983_s21, 0 }
  0x76   : > { %s466_s26 = sand.u32 (%p1992_p12), 1, %s1584_s14   ;;  %s1239_s19 = sshll.u32 (%p1992_p12), %s1592_s16, 2 }
  0x77   : > { %464 = sbr.rel (!%p1992_p12) target bundleno = 126 (0x7e), region = 130  ;;  %s1238_s22 = sshll.u32 (%p1992_p12), %s466_s26, 3 }
  0x78   : > { %s473_s18 = scalar_lea.vmem (%p1992_p12), %s1965_s2, %s1239_s19  ;;  %s468_s28 = scalar_lea.vmem (%p1992_p12), [#allocation6], %s1238_s22 }
  0x79   : > { %v489_v4 = vld [vmem:[%s473_s18] sm:$0xf] (%p1992_p12)  ;;  %v491_v5 = vld [vmem:[%s473_s18 + $0x8] sm:$0xf] (%p1992_p12) }
  0x7a   : > { %490 = vst [vmem:[%s468_s28] sm:$0xf] (%p1992_p12), %v489_v4  ;;  %492 = vst [vmem:[%s468_s28 + $0x4] sm:$0xf] (%p1992_p12), %v491_v5 }
  0x7e PF: > { %p1993_p7 = scmp.ne.s32.totalorder %s1984_s23, 0 }
  0x7f   : > { %s525_s21 = sand.u32 (!%p1993_p7), 1, %s1580_s13   ;;  %p1994_p3 = scmp.ne.s32.totalorder (!%p1993_p7), %s1985_s24, 0 }
  0x80   : > { %522 = sbr.rel (%p1993_p7) target bundleno = 2115 (0x843), region = 171  ;;  %s1241_s25 = sshll.u32 (!%p1993_p7), %s525_s21, 3 }
  0x81   : > { %s1813_s11 = scalar_lea.vmem (!%p1993_p7), [#allocation4], %s1241_s25  ;;  %s1815_s27 = scalar_lea.vmem (!%p1993_p7), [#allocation5], %s1241_s25 }
  0x82   : > { %s1817_s30 = scalar_lea.vmem (!%p1993_p7), [#allocation6], %s1241_s25 }
  0x87   : > { %1567 = dma.done.wait (%p1994_p3), [#allocation8], 16  }
  0x88   : > { %1569 = vsyncadd (%p1994_p3), [#allocation8], 4294967280 }
  0x89   : > { %1571 = dma.done.wait (%p1994_p3), [#allocation11], 32  }
  0x8a   : > { %1573 = vsyncadd (%p1994_p3), [#allocation11], 4294967264  ;;  %p1247_p13 = scmp.ne.s32.totalorder %s1588_s15, 0 }
  0x8b   : > { %v613_v6 = vld [vmem:[%s1815_s27] sm:$0x1] (!%p1247_p13)  ;;  %v614_v7 = vld [vmem:[%s1815_s27 + $0x4] sm:$0x1] (!%p1247_p13)  ;;  %v626_v10 = vld [vmem:[%s1817_s30] sm:$0x1] (!%p1247_p13) }
  0x8c   : > { %598 = sbr.rel (%p1247_p13) target bundleno = 265 (0x109), region = 199  ;;  %v615_v8 = vunpack.c.l.bf16 (!%p1247_p13), %v613_v6  ;;  %v616_v9 = vunpack.c.l.bf16 (!%p1247_p13), %v614_v7  ;;  %v627_v11 = vld [vmem:[%s1817_s30 + $0x4] sm:$0x1] (!%p1247_p13)  ;;  %vm608_vm0 = vcmask (!%p1247_p13), 1041409   ;;  %v628_v12 = vunpack.c.l.bf16 (!%p1247_p13), %v626_v10  ;;  %v601_v14 = vld [vmem:[%s1813_s11] sm:$0x1] (!%p1247_p13) }
  0x8d   : > { %v629_v13 = vunpack.c.l.bf16 (!%p1247_p13), %v627_v11  ;;  %v602_v15 = vld [vmem:[%s1813_s11 + $0x4] sm:$0x1] (!%p1247_p13)  ;;  %v603_v17 = vunpack.c.l.bf16 (!%p1247_p13), %v601_v14  ;;  %vm599_vm1 = vcmask (!%p1247_p13), 779264   ;;  %vm611_vm2 = vcmask (!%p1247_p13), 254976   ;;  %s1602_s13 = smov (!%p1247_p13), 32   ;;  %s1603_s23 = smov (!%p1247_p13), 64  }
  0x8e   : > { %v619_v16 = vrot.slane (!%p1247_p13), %v616_v9, 7  ;;  %v604_v18 = vunpack.c.l.bf16 (!%p1247_p13), %v602_v15  ;;  %v1601_v22 = vmov (!%p1247_p13), 0.0   ;;  %vm624_vm3 = vcmask (!%p1247_p13), 517376  }
  0x8f   : > { %v632_v19 = vrot.slane (!%p1247_p13), %v629_v13, 7  ;;  %600 = vst.msk [vmem:[#allocation2] sm:$0x3] (!%p1247_p13), %vm599_vm1, %v1601_v22  ;;  %vm637_vm4 = vcmask (!%p1247_p13), 779776  }
  0x90   : > { %v620_v20 = vsel (!%p1247_p13), %vm608_vm0, %v619_v16, %v615_v8  ;;  %v607_v21 = vrot.slane (!%p1247_p13), %v604_v18, 7 }
  0x91   : > { %621 = vrot.lane.b32.xlu0 (!%p1247_p13), %v620_v20, %s1602_s13  ;;  %v633_v23 = vsel (!%p1247_p13), %vm608_vm0, %v632_v19, %v628_v12 }
  0x92   : > { %v609_v24 = vsel (!%p1247_p13), %vm608_vm0, %v607_v21, %v603_v17 }
  0x93   : > { %612 = vst.msk [vmem:[#allocation3] sm:$0x3] %vm611_vm2, %v609_v24 }
  0x95   : > { %634 = vrot.lane.b32.xlu0 %v633_v23, %s1603_s23 }
 0x103   : > { %v622_v25 = vpop.permute.xlu0 %621 }
 0x104   : > { %625 = vst.msk [vmem:[#allocation3] sm:$0x3] %vm624_vm3, %v622_v25 }
 0x107   : > { %v635_v26 = vpop.permute.xlu0 %634 }
 0x108   : > { %638 = vst.msk [vmem:[#allocation3] sm:$0x3] %vm637_vm4, %v635_v26 }
 0x109 PF: > { %v639_v27 = vlaneseq  ;;  %s1248_s24 = sshll.u32 %s1588_s15, 3  ;;  %v1274_v28 = vld [vmem:[%s1813_s11] sm:$0xff]   ;;  %v1278_v30 = vld [vmem:[%s1815_s27] sm:$0xff]   ;;  %vm652_vm5 = vcmask 261120   ;;  %vm669_vm7 = vcmask 1041409   ;;  %vm673_vm8 = vcmask 254976  }
 0x10a   : > { %v642_v29 = vstv %s1248_s24  ;;  %v1275_v32 = vunpack.c.l.bf16 %v1274_v28  ;;  %v1276_v33 = vunpack.c.h.bf16 %v1274_v28  ;;  %v1279_v34 = vunpack.c.l.bf16 %v1278_v30  ;;  %v1282_v36 = vld [vmem:[%s1817_s30] sm:$0xff]   ;;  %s1604_s10 = smov 32   ;;  %s1605_s5 = smov 64  }
 0x10b   : > { %v640_v31 = vshrl.u32 %v639_v27, 7  ;;  %v1280_v35 = vunpack.c.h.bf16 %v1278_v30  ;;  %v1283_v38 = vunpack.c.l.bf16 %v1282_v36  ;;  %v1284_v39 = vunpack.c.h.bf16 %v1282_v36  ;;  %p1249_p0 = scmp.ne.s32.totalorder %s1588_s15, 1 }
 0x10c   : > { %v651_v14 = vld [vmem:[#allocation2] sm:$0x3]  ;;  %vm703_vm9 = vcmask 517376   ;;  %vm733_vm10 = vcmask 779776   ;;  %s1606_s15 = smov (!%p1249_p0), 96   ;;  %s1607_s12 = smov (!%p1249_p0), 64  }
 0x10d   : > { %v643_v37 = vadd.s32 %v642_v29, %v640_v31  ;;  %vm1609_vm11 = vmmov (!%p1249_p0), 0   ;;  %vm957_vm12 = vcmask (!%p1249_p0), 785408   ;;  %vm1088_vm13 = vcmask (!%p1249_p0), 779264  }
 0x10f   : > { %vm644_vm6 = vcmp.lt.s32.totalorder %v643_v37, 9 }
 0x110   : > { %v679_v40 = vsel %vm644_vm6, %v1279_v34, 0.0  ;;  %v680_v41 = vsel %vm644_vm6, %v1280_v35, 0.0  ;;  %v649_v42 = vsel %vm644_vm6, %v1275_v32, 0.0  ;;  %v650_v43 = vsel %vm644_vm6, %v1276_v33, 0.0  ;;  %v739_v35 = vld [vmem:[#allocation3] sm:$0x3] (!%p1249_p0) }
 0x111   : > { %v682_v44 = vsel %vm652_vm5, %v679_v40, 0.0  ;;  %v689_v45 = vsel %vm652_vm5, %v680_v41, 0.0  ;;  %v653_v46 = vsel %vm652_vm5, %v649_v42, 0.0  ;;  %v660_v47 = vsel %vm652_vm5, %v650_v43, 0.0 }
 0x112   : > { %v683_v48 = vrot.slane %v682_v44, 4  ;;  %v690_v49 = vrot.slane %v689_v45, 4  ;;  %v654_v50 = vrot.slane %v653_v46, 4  ;;  %v661_v51 = vrot.slane %v660_v47, 4 }
 0x113   : > { %v709_v52 = vsel %vm644_vm6, %v1283_v38, 0.0  ;;  %v710_v53 = vsel %vm644_vm6, %v1284_v39, 0.0  ;;  %v743_v37 = vsel (!%p1249_p0), %vm673_vm8, %v739_v35, 0.0 }
 0x114   : > { %v684_v54 = vadd.f32 %v683_v48, %v682_v44  ;;  %v691_v55 = vadd.f32 %v690_v49, %v689_v45  ;;  %v655_v56 = vadd.f32 %v654_v50, %v653_v46  ;;  %v662_v57 = vadd.f32 %v661_v51, %v660_v47 }
 0x115   : > { %v712_v58 = vsel %vm652_vm5, %v709_v52, 0.0  ;;  %v719_v59 = vsel %vm652_vm5, %v710_v53, 0.0 }
 0x116   : > { %v685_v60 = vrot.slane %v684_v54, 2  ;;  %v692_v61 = vrot.slane %v691_v55, 2  ;;  %v656_v62 = vrot.slane %v655_v56, 2  ;;  %v663_v63 = vrot.slane %v662_v57, 2 }
 0x117   : > { %v713_v0 = vrot.slane %v712_v58, 4  ;;  %v720_v1 = vrot.slane %v719_v59, 4 }
 0x118   : > { %v686_v2 = vadd.f32 %v685_v60, %v684_v54  ;;  %v693_v3 = vadd.f32 %v692_v61, %v691_v55  ;;  %v657_v4 = vadd.f32 %v656_v62, %v655_v56  ;;  %v664_v5 = vadd.f32 %v663_v63, %v662_v57 }
 0x119   : > { %v714_v6 = vadd.f32 %v713_v0, %v712_v58  ;;  %v721_v7 = vadd.f32 %v720_v1, %v719_v59 }
 0x11a   : > { %v687_v8 = vrot.slane %v686_v2, 1  ;;  %v694_v9 = vrot.slane %v693_v3, 1  ;;  %v658_v10 = vrot.slane %v657_v4, 1  ;;  %v665_v11 = vrot.slane %v664_v5, 1 }
 0x11b   : > { %v715_v12 = vrot.slane %v714_v6, 2  ;;  %v722_v13 = vrot.slane %v721_v7, 2 }
 0x11c   : > { %v688_v15 = vadd.f32 %v687_v8, %v686_v2  ;;  %v695_v16 = vadd.f32 %v694_v9, %v693_v3  ;;  %v659_v17 = vadd.f32 %v658_v10, %v657_v4  ;;  %v666_v18 = vadd.f32 %v665_v11, %v664_v5 }
 0x11d   : > { %v716_v19 = vadd.f32 %v715_v12, %v714_v6  ;;  %v723_v20 = vadd.f32 %v722_v13, %v721_v7 }
 0x11e   : > { %v698_v21 = vsel %vm669_vm7, %v695_v16, %v688_v15  ;;  %v670_v22 = vsel %vm669_vm7, %v666_v18, %v659_v17 }
 0x11f   : > { %699 = vrot.lane.b32.xlu0 %v698_v21, %s1604_s10  ;;  %v672_v23 = vadd.f32 %v670_v22, %v651_v14  ;;  %v717_v24 = vrot.slane %v716_v19, 1  ;;  %v724_v25 = vrot.slane %v723_v20, 1 }
 0x121   : > { %674 = vst.msk [vmem:[#allocation2] sm:$0x3] %vm673_vm8, %v672_v23  ;;  %v718_v26 = vadd.f32 %v717_v24, %v716_v19  ;;  %v725_v27 = vadd.f32 %v724_v25, %v723_v20 }
 0x123   : > { %v728_v28 = vsel %vm669_vm7, %v725_v27, %v718_v26 }
 0x124   : > { %729 = vrot.lane.b32.xlu0 %v728_v28, %s1605_s5 }
 0x128   : > { %v681_v29 = vld [vmem:[#allocation2] sm:$0x3] }
 0x143   : > { %744 = vadd.xlane.f32.xlu0 (!%p1249_p0), %v743_v37 }
 0x191   : > { %v700_v30 = vpop.permute.xlu0 %699 }
 0x192   : > { %v702_v31 = vadd.f32 %v700_v30, %v681_v29 }
 0x194   : > { %704 = vst.msk [vmem:[#allocation2] sm:$0x3] %vm703_vm9, %v702_v31 }
 0x196   : > { %v730_v32 = vpop.permute.xlu0 %729 }
 0x198   : > { %738 = sbr.rel (%p1249_p0) target bundleno = 2084 (0x824), region = 203 }
 0x19b   : > { %v711_v33 = vld [vmem:[#allocation2] sm:$0x3] }
 0x19c   : > { %v732_v34 = vadd.f32 %v730_v32, %v711_v33 }
 0x19e   : > { %734 = vst.msk [vmem:[#allocation2] sm:$0x3] %vm733_vm10, %v732_v34 }
 0x1a5   : > { %v740_v36 = vld [vmem:[#allocation2] sm:$0x3] }
 0x1a6   : > { %v741_v38 = vsub.f32 %v740_v36, %v739_v35 }
 0x1a8   : > { %v742_v39 = vmul.f32 0.125, %v741_v38 }
 0x1aa   : > { %v746_v40 = vsel %vm673_vm8, %v742_v39, 0.0 }
 0x1ab   : > { %747 = vadd.xlane.f32.xlu0 %v746_v40 }
 0x1d0   : > { %v745_v41 = vpop.xlane.xlu0 %744 }
 0x238   : > { %v748_v42 = vpop.xlane.xlu0 %747 }
 0x239   : > { %v749_v43 = vadd.f32 %v748_v42, %v745_v41 }
 0x23b   : > { %v750_v44 = vmul.f32 0.015625, %v749_v43  ;;  %v1418_v43 = vld [vmem:[%s1971_s8] sm:$0xff]  }
 0x23d   : > { %v751_v45 = vsub.f32 %v739_v35, %v750_v44  ;;  %v752_v46 = vsub.f32 %v742_v39, %v750_v44  ;;  %v1419_v44 = vld [vmem:[%s1970_s7] sm:$0xff]  }
 0x23f   : > { %v753_v47 = vmul.f32 %v751_v45, %v751_v45  ;;  %v757_v49 = vmul.f32 %v752_v46, %v752_v46 }
 0x241   : > { %v754_v48 = vsel %vm673_vm8, %v753_v47, 0.0  ;;  %v758_v50 = vsel %vm673_vm8, %v757_v49, 0.0  ;;  %v1421_v47 = vld [vmem:[%s1970_s7 + $0x8] sm:$0xff]   ;;  %v1423_v49 = vld [vmem:[%s1970_s7 + $0x10] sm:$0xff]  }
 0x242   : > { %755 = vadd.xlane.f32.xlu1 %v754_v48  ;;  %v1422_v48 = vld [vmem:[%s1971_s8 + $0x10] sm:$0xff]  }
 0x246   : > { %759 = vadd.xlane.f32.xlu1 %v758_v50  ;;  %v1424_v50 = vld [vmem:[%s1971_s8 + $0x18] sm:$0xff]  }
 0x2cf   : > { %v756_v51 = vpop.xlane.xlu1 %755 }
 0x2d3   : > { %v760_v52 = vpop.xlane.xlu1 %759 }
 0x2d4   : > { %v761_v53 = vadd.f32 %v760_v52, %v756_v51  ;;  %v1425_v51 = vld [vmem:[%s1970_s7 + $0x18] sm:$0xff]   ;;  %v1426_v52 = vld [vmem:[%s1971_s8 + $0x20] sm:$0xff]  }
 0x2d6   : > { %v762_v54 = vmul.f32 0.015625, %v761_v53  ;;  %v1427_v53 = vld [vmem:[%s1970_s7 + $0x20] sm:$0xff]  }
 0x2d8   : > { %v763_v55 = vadd.f32 1e-05, %v762_v54  ;;  %v1428_v54 = vld [vmem:[%s1971_s8 + $0x28] sm:$0xff]  }
 0x2da   : > { %1430 = vrsqrt.f32 %v763_v55  ;;  %v1429_v55 = vld [vmem:[%s1970_s7 + $0x28] sm:$0xff]  }
 0x2e4   : > { %v1431_v56 = vpop.eup %1430 }
 0x2e5   : > { %v765_v57 = vmul.f32 %v1431_v56, %v751_v45  ;;  %v767_v58 = vmul.f32 %v1431_v56, %v752_v46  ;;  %v1608_v45 = vmov 0.0   ;;  %v1420_v46 = vld [vmem:[%s1971_s8 + $0x8] sm:$0xff]  }
 0x2e6   : > { %1299 = vmatprep.subr.bf16.mxu0 %v1608_v45  ;;  %1315 = vmatprep.subr.bf16.mxu1 %v1608_v45 }
 0x2e7   : > { %766 = vst.msk [vmem:[#allocation3] sm:$0x3] %vm673_vm8, %v765_v57  ;;  %768 = vst.msk [vmem:[#allocation2] sm:$0x3] %vm673_vm8, %v767_v58  ;;  %1300 = vmatpush3.bf16.msra.mxu0 %v1418_v43  ;;  %1316 = vmatpush3.bf16.msra.mxu1 %v1419_v44 }
 0x2e8   : > { %1301 = vmatprep.subr.bf16.mxu0 %v1608_v45  ;;  %1317 = vmatprep.subr.bf16.mxu1 %v1608_v45 }
 0x2e9   : > { %1311 = vmatprep.mubr.msk.bf16.mxu0 %vm1609_vm11, %v1608_v45  ;;  %1327 = vmatprep.mubr.msk.bf16.mxu1 %vm1609_vm11, %v1608_v45 }
 0x2eb   : > { %1302 = vmatpush3.bf16.msra.mxu0 %v1420_v46  ;;  %1318 = vmatpush3.bf16.msra.mxu1 %v1421_v47 }
 0x2ec   : > { %1303 = vmatprep.subr.bf16.mxu0 %v1608_v45  ;;  %1319 = vmatprep.subr.bf16.mxu1 %v1608_v45 }
 0x2ee   : > { %v769_v59 = vld [vmem:[#allocation3] sm:$0x3]  ;;  %v770_v60 = vld [vmem:[#allocation2] sm:$0x3] }
 0x2ef   : > { %774 = vrot.lane.b32.xlu0 %v769_v59, %s1606_s15  ;;  %v771_v61 = vsub.f32 %v770_v60, %v769_v59  ;;  %1304 = vmatpush3.bf16.msra.mxu0 %v1422_v48 }
 0x2f0   : > { %1320 = vmatpush3.bf16.msra.mxu1 %v1423_v49  ;;  %1305 = vmatprep.subr.bf16.mxu0 %v1608_v45 }
 0x2f1   : > { %v772_v62 = vmul.f32 0.125, %v771_v61  ;;  %1321 = vmatprep.subr.bf16.mxu1 %v1608_v45 }
 0x2f3   : > { %781 = vrot.lane.b32.xlu1 %v772_v62, %s1606_s15  ;;  %1306 = vmatpush3.bf16.msra.mxu0 %v1424_v50 }
 0x2f4   : > { %1322 = vmatpush3.bf16.msra.mxu1 %v1425_v51  ;;  %1307 = vmatprep.subr.bf16.mxu0 %v1608_v45 }
 0x2f5   : > { %1323 = vmatprep.subr.bf16.mxu1 %v1608_v45 }
 0x2f7   : > { %1308 = vmatpush3.bf16.msra.mxu0 %v1426_v52 }
 0x2f8   : > { %1324 = vmatpush3.bf16.msra.mxu1 %v1427_v53  ;;  %1309 = vmatprep.subr.bf16.mxu0 %v1608_v45 }
 0x2f9   : > { %1325 = vmatprep.subr.bf16.mxu1 %v1608_v45 }
 0x2fb   : > { %1310 = vmatpush3.bf16.msra.mxu0 %v1428_v54 }
 0x2fc   : > { %1326 = vmatpush3.bf16.msra.mxu1 %v1429_v55 }
 0x361   : > { %v775_v63 = vpop.permute.xlu0 %774 }
 0x362   : > { %v777_v0 = vsel %vm673_vm8, %v775_v63, 0.0 }
 0x363   : > { %778 = vadd.xlane.f32.xlu1 %v777_v0  ;;  %v1252_v0 = vld [vmem:[#allocation7] ss:$0 sm:$0xff] }
 0x365   : > { %v782_v1 = vpop.permute.xlu1 %781 }
 0x366   : > { %v784_v2 = vsel %vm673_vm8, %v782_v1, 0.0  ;;  %v1250_v1 = vld [vmem:[%s1966_s3] ss:$0 sm:$0xff] }
 0x367   : > { %785 = vadd.xlane.f32.xlu0 %v784_v2  ;;  %v1253_v2 = vld [vmem:[#allocation12] ss:$0 sm:$0xff] }
 0x3f0   : > { %v779_v3 = vpop.xlane.xlu1 %778 }
 0x3f4   : > { %v786_v4 = vpop.xlane.xlu0 %785 }
 0x3f5   : > { %v787_v5 = vadd.f32 %v786_v4, %v779_v3 }
 0x3f7   : > { %v788_v6 = vmul.f32 0.015625, %v787_v5  ;;  %v1251_v5 = vld [vmem:[#allocation10] ss:$0 sm:$0xff] }
 0x3f9   : > { %v789_v7 = vsub.f32 %v769_v59, %v788_v6  ;;  %v790_v8 = vsub.f32 %v772_v62, %v788_v6 }
 0x3fb   : > { %v799_v9 = vmul.f32 %v790_v8, %v790_v8  ;;  %v791_v10 = vmul.f32 %v789_v7, %v789_v7 }
 0x3fd   : > { %801 = vrot.lane.b32.xlu1 %v799_v9, %s1606_s15  ;;  %793 = vrot.lane.b32.xlu0 %v791_v10, %s1606_s15 }
 0x46f   : > { %v802_v11 = vpop.permute.xlu1 %801  ;;  %v794_v12 = vpop.permute.xlu0 %793 }
 0x470   : > { %v804_v13 = vsel %vm673_vm8, %v802_v11, 0.0  ;;  %v796_v14 = vsel %vm673_vm8, %v794_v12, 0.0 }
 0x471   : > { %805 = vadd.xlane.f32.xlu0 %v804_v13  ;;  %797 = vadd.xlane.f32.xlu1 %v796_v14  ;;  %v1268_v14 = vld [vmem:[%s1972_s9] ss:$0 sm:$0xff] }
 0x4fe   : > { %v798_v15 = vpop.xlane.xlu1 %797  ;;  %v806_v16 = vpop.xlane.xlu0 %805 }
 0x4ff   : > { %v807_v17 = vadd.f32 %v806_v16, %v798_v15 }
 0x501   : > { %v808_v18 = vmul.f32 0.015625, %v807_v17 }
 0x503   : > { %v809_v19 = vadd.f32 1e-05, %v808_v18 }
 0x505   : > { %1432 = vrsqrt.f32 %v809_v19 }
 0x50f   : > { %v1433_v20 = vpop.eup %1432 }
 0x510   : > { %v811_v21 = vmul.f32 %v1433_v20, %v789_v7  ;;  %v813_v22 = vmul.f32 %v1433_v20, %v790_v8 }
 0x512   : > { %812 = vst.msk [vmem:[#allocation3] sm:$0x3] %vm703_vm9, %v811_v21  ;;  %814 = vst.msk [vmem:[#allocation2] sm:$0x3] %vm703_vm9, %v813_v22 }
 0x519   : > { %v815_v23 = vld [vmem:[#allocation3] sm:$0x3]  ;;  %v816_v24 = vld [vmem:[#allocation2] sm:$0x3] }
 0x51a   : > { %820 = vrot.lane.b32.xlu0 %v815_v23, %s1607_s12  ;;  %v817_v25 = vsub.f32 %v816_v24, %v815_v23 }
 0x51c   : > { %v818_v26 = vmul.f32 0.125, %v817_v25 }
 0x51e   : > { %827 = vrot.lane.b32.xlu1 %v818_v26, %s1607_s12 }
 0x58c   : > { %v821_v27 = vpop.permute.xlu0 %820 }
 0x58d   : > { %v823_v28 = vsel %vm673_vm8, %v821_v27, 0.0 }
 0x58e   : > { %824 = vadd.xlane.f32.xlu1 %v823_v28 }
 0x590   : > { %v828_v29 = vpop.permute.xlu1 %827 }
 0x591   : > { %v830_v30 = vsel %vm673_vm8, %v828_v29, 0.0 }
 0x592   : > { %831 = vadd.xlane.f32.xlu0 %v830_v30 }
 0x61b   : > { %v825_v31 = vpop.xlane.xlu1 %824 }
 0x61f   : > { %v832_v32 = vpop.xlane.xlu0 %831 }
 0x620   : > { %v833_v33 = vadd.f32 %v832_v32, %v825_v31 }
 0x622   : > { %v834_v34 = vmul.f32 0.015625, %v833_v33 }
 0x624   : > { %v835_v35 = vsub.f32 %v815_v23, %v834_v34  ;;  %v836_v36 = vsub.f32 %v818_v26, %v834_v34 }
 0x626   : > { %v845_v37 = vmul.f32 %v836_v36, %v836_v36  ;;  %v837_v38 = vmul.f32 %v835_v35, %v835_v35 }
 0x628   : > { %847 = vrot.lane.b32.xlu1 %v845_v37, %s1607_s12  ;;  %839 = vrot.lane.b32.xlu0 %v837_v38, %s1607_s12 }
 0x69a   : > { %v848_v39 = vpop.permute.xlu1 %847  ;;  %v840_v40 = vpop.permute.xlu0 %839 }
 0x69b   : > { %v850_v41 = vsel %vm673_vm8, %v848_v39, 0.0  ;;  %v842_v42 = vsel %vm673_vm8, %v840_v40, 0.0 }
 0x69c   : > { %851 = vadd.xlane.f32.xlu0 %v850_v41  ;;  %843 = vadd.xlane.f32.xlu1 %v842_v42 }
 0x729   : > { %v844_v56 = vpop.xlane.xlu1 %843  ;;  %v852_v57 = vpop.xlane.xlu0 %851 }
 0x72a   : > { %v853_v58 = vadd.f32 %v852_v57, %v844_v56 }
 0x72c   : > { %v854_v59 = vmul.f32 0.015625, %v853_v58 }
 0x72e   : > { %v855_v60 = vadd.f32 1e-05, %v854_v59 }
 0x730   : > { %1434 = vrsqrt.f32 %v855_v60 }
 0x73a   : > { %v1435_v61 = vpop.eup %1434 }
 0x73b   : > { %v857_v62 = vmul.f32 %v1435_v61, %v835_v35  ;;  %v859_v63 = vmul.f32 %v1435_v61, %v836_v36 }
 0x73d   : > { %858 = vst.msk [vmem:[#allocation3] sm:$0x3] %vm733_vm10, %v857_v62  ;;  %860 = vst.msk [vmem:[#allocation2] sm:$0x3] %vm733_vm10, %v859_v63 }
 0x744   : > { %v878_v3 = vld [vmem:[#allocation2] sm:$0x3]  ;;  %v861_v4 = vld [vmem:[#allocation3] sm:$0x3] }
 0x745   : > { %v886_v6 = vmul.f32 %v1252_v0, %v878_v3  ;;  %v869_v7 = vmul.f32 %v1250_v1, %v861_v4 }
 0x747   : > { %v894_v8 = vadd.f32 %v1253_v2, %v886_v6  ;;  %v877_v9 = vadd.f32 %v1251_v5, %v869_v7 }
 0x749   : > { %v908_v10 = vpack.c.bf16 %v894_v8, %v894_v8  ;;  %v895_v11 = vpack.c.bf16 %v877_v9, %v877_v9 }
 0x74b   : > { %1312 = vmatmul.mubr.msk.bf16.vlgmr.msra.gmra.mrb[0].mxu0 %vm957_vm12, %v908_v10  ;;  %1328 = vmatmul.mubr.msk.bf16.vlgmr.msra.gmra.mrb[0].mxu1 %vm957_vm12, %v895_v11 }
 0x81e   : > { %v995_v12 = vpop.f32.mrb[0].mxu0  ;;  %v1074_v13 = vpop.f32.mrb[0].mxu1 }
 0x81f   : > { %v1075_v15 = vadd.f32 %v1074_v13, %v995_v12  ;;  %v1313_v16 = vpop.f32.mrb[1].mxu0  ;;  %v1329_v17 = vpop.f32.mrb[1].mxu1 }
 0x820   : > { %v998_v18 = vpop.f32.mrb[2].mxu0  ;;  %v1077_v19 = vpop.f32.mrb[2].mxu1 }
 0x821   : > { %v1087_v20 = vadd.f32 %v1268_v14, %v1075_v15  ;;  %v1314_v21 = vpop.f32.mrb[3].mxu0  ;;  %v1330_v22 = vpop.f32.mrb[3].mxu1 }
 0x823   : > { %1089 = vst.msk [vmem:[#allocation13] sm:$0x3] %vm1088_vm13, %v1087_v20 }
 0x824 PF: > { %s1995_s11 = sadd.s32 4294967295, %s1596_s17   ;;  %s1610_s30 = smov [#allocation13]  }
 0x825   : > { %p1922_p1 = scmp.eq.s32.totalorder %s1995_s11, 1  ;;  %s1099_s13 = sshll.u32 %s1610_s30, 4  ;;  %s1100_s13 = int_to_ptr.vmem [resolvable:$true] %s1099_s13 }
 0x826   : > { %s1520_s23 = scalar_lea.vmem %s1100_s13, 32  ;;  %p1527_p6 = scmp.lt.s32.totalorder %s1100_s13, %s1100_s13 }
 0x827   : > { %p1521_p2 = scmp.ne.s32.totalorder %s1100_s13, %s1520_s23  ;;  %p1528_p9 = scmp.lt.s32.totalorder %s1520_s23, %s1520_s23 }
 0x829   : > { %p1522_p4 = pnand %p1521_p2, %p1922_p1  ;;  %p1529_p11 = por %p1528_p9, %p1527_p6 }
 0x82b   : > { %p1523_p5 = pneg %p1522_p4 }
 0x82d   : > { %p1530_p8 = pnand %p1529_p11, %p1523_p5 }
 0x82f   : > { %1533 = shalt.err (!%p1530_p8)
}
 0x830   : > { %s1997_s5 = sld [smem:[#allocation20_spill]] }
 0x836   : > { %s1534_s15 = scalar_lea.hbm %s1997_s5, 32 }
 0x837   : > { %p1535_p10 = scmp.ne.s32.totalorder %s1997_s5, %s1534_s15  ;;  %p1540_p3 = scmp.lt.u32.totalorder %s1534_s15, %s1997_s5 }
 0x839   : > { %p1536_p12 = pnand %p1535_p10, %p1922_p1 }
 0x83b   : > { %p1537_p7 = pneg %p1536_p12 }
 0x83d   : > { %p1542_p13 = pnand %p1540_p3, %p1537_p7 }
 0x83f   : > { %1545 = shalt.err (!%p1542_p13)
}
 0x840   : > { %1344 = dma.vmem_to_hbm [thread:$0]  (%p1922_p1), %s1100_s13, 32, %s1997_s5, [#allocation9]  }
 0x841   : > { %1575 = dma.done.wait (%p1922_p1), [#allocation9], 32  }
 0x842   : > { %1577 = vsyncadd (%p1922_p1), [#allocation9], 4294967264 }
 0x843 PF: > { %s23_s17 = sadd.s32 1, %s1596_s17   ;;  %s1998_s18 = sld [smem:[#allocation18_spill]] }
 0x844   : > { %p20_p0 = scmp.ge.s32.totalorder %s23_s17, 4   ;;  %s1999_s28 = sld [smem:[#allocation17_spill]] }
 0x845   : > { %s2000_s13 = smov %s1584_s14  ;;  %s2002_s15 = smov %s1592_s16 }
 0x846   :  { %22 = sbr.rel (!%p20_p0) target bundleno = 8 (0x8), region = 253 }
 0x849   : > { %s2001_s14 = smov %s1998_s18 }
 0x84a   : > { %s2003_s16 = smov %s1999_s28 }
 0x84d   :  { %1112 = vsyncpa [#allocation8], 1 }
 0x84e   :  { %1114 = vsyncpa [#allocation8 + $0x1], 1 }
 0x84f   :  { %1115 = vsyncpa [#allocation11], 1 }
 0x850   :  { %1116 = vsyncpa [#allocation9], 1 }
 0x851   :  { %1118 = vsyncpa [#allocation9 + $0x1], 1 }

</bundles_post_ra>
